<compile_context>
chip_gen: v7x
topology: tpu7x:2x2x1
jax: 0.10.0
libtpu: 0.0.40
codegen_flags: <defaults>
</compile_context>

<pallas_src>
import math

import numpy as np
import jax
import jax.numpy as jnp
from jax.experimental import pallas as pl
from jax.experimental.pallas import tpu as pltpu


_FLAT_R_MAX_BYTES = 2 * 1024 * 1024     # use fused lane-dense kernel when R_flat fits this
_BLOCK_VMEM_BUDGET = 16 * 1024 * 1024   # budget for double-buffered x/out blocks per step
_VMEM_LIMIT_BYTES = 48 * 1024 * 1024    # < 64 MiB physical (v7x), > scoped defaults (v5e/v6e)


def _upsample_flat_kernel(x_ref, r_ref, o_ref):
    # x_ref: (Bc, H*W)   r_ref: (H*W, Ho*Wo)   o_ref: (Bc, Ho*Wo)
    # Single lane-dense matmul; each column of r has exactly one 1 -> bit-exact nearest copy.
    o_ref[...] = jnp.dot(
        x_ref[...], r_ref[...], preferred_element_type=jnp.float32
    ).astype(o_ref.dtype)


def _upsample_sep_kernel(x_ref, rwt_ref, rh_ref, o_ref):
    # x_ref: (Bc, H, W)   rwt_ref: (W, Wo)   rh_ref: (Ho, H)   o_ref: (Bc, Ho, Wo)
    bc, h, w = x_ref.shape
    wo = rwt_ref.shape[1]
    ho = rh_ref.shape[0]
    x = x_ref[...]
    # W direction: one big slab matmul over all Bc*H rows (lane dim = Wo).
    xw = jnp.dot(x.reshape(bc * h, w), rwt_ref[...],
                 preferred_element_type=jnp.float32)
    xw = xw.reshape(bc, h, wo).astype(x.dtype)   # exact: each element is a copied input value
    # H direction: batched matmul with the row-replication matrix.
    rh = jnp.broadcast_to(rh_ref[...], (bc, ho, h)).astype(x.dtype)
    out = jnp.einsum("boh,bhw->bow", rh, xw, preferred_element_type=jnp.float32)
    o_ref[...] = out.astype(o_ref.dtype)


def _pick_bc(nc, per_plane_bytes):
    """Largest divisor of nc whose blocks fit the VMEM budget, preferring >=2 grid steps."""
    divisors = [d for d in range(1, nc + 1) if nc % d == 0]
    fits = [d for d in divisors if d * per_plane_bytes <= _BLOCK_VMEM_BUDGET] or [1]
    multi = [d for d in fits if nc // d >= 2]   # keep the parallel axis >=2 for v7x's 2 TCs
    return max(multi) if multi else max(fits)


def upsample_nearest(x, scale_factor):
    """Pallas equivalent of F.interpolate(x, scale_factor=scale_factor, mode='nearest'), NCHW."""
    if isinstance(scale_factor, (tuple, list)):
        sh, sw = float(scale_factor[0]), float(scale_factor[1])
    else:
        sh = sw = float(scale_factor)

    N, C, H, W = x.shape
    Ho = int(math.floor(H * sh))
    Wo = int(math.floor(W * sw))
    NC = N * C

    orig_dtype = x.dtype
    if jnp.issubdtype(orig_dtype, jnp.floating):
        cdtype = orig_dtype                 # bf16/f16/f32: 0/1 matmul is bit-exact
        xc = x
    else:
        cdtype = jnp.float32                # exact for integer inputs with |x| < 2**24
        xc = x.astype(jnp.float32)
    itemsize = np.dtype(cdtype).itemsize

    # Exact integer source-index math: src = floor(dst * in / out), matching PyTorch 'nearest'.
    src_h = np.minimum((np.arange(Ho, dtype=np.int64) * H) // Ho, H - 1)
    src_w = np.minimum((np.arange(Wo, dtype=np.int64) * W) // Wo, W - 1)
    rh_np = (src_h[:, None] == np.arange(H)[None, :]).astype(np.float32)   # (Ho, H)
    rw_np = (src_w[:, None] == np.arange(W)[None, :]).astype(np.float32)   # (Wo, W)

    per_plane_bytes = 2 * (H * W + Ho * Wo) * itemsize   # double-buffered in + out blocks
    bc = _pick_bc(NC, per_plane_bytes)
    G = NC // bc

    cparams = pltpu.CompilerParams(
        dimension_semantics=("parallel",),
        vmem_limit_bytes=_VMEM_LIMIT_BYTES,
    )

    flat_r_bytes = (H * W) * (Ho * Wo) * itemsize
    if flat_r_bytes <= _FLAT_R_MAX_BYTES:
        # Fused path: fully lane-dense input (H*W lanes) and output (Ho*Wo lanes) blocks.
        r_flat = jnp.asarray(np.kron(rh_np, rw_np).T, dtype=cdtype)        # (H*W, Ho*Wo)
        xf = xc.reshape(G, bc, H * W)
        out = pl.pallas_call(
            _upsample_flat_kernel,
            out_shape=jax.ShapeDtypeStruct((G, bc, Ho * Wo), cdtype),
            grid_spec=pltpu.PrefetchScalarGridSpec(
                num_scalar_prefetch=0,
                grid=(G,),
                in_specs=[
                    pl.BlockSpec((None, bc, H * W), lambda i: (i, 0, 0)),
                    pl.BlockSpec((H * W, Ho * Wo), lambda i: (0, 0)),
                ],
                out_specs=pl.BlockSpec((None, bc, Ho * Wo), lambda i: (i, 0, 0)),
            ),
            compiler_params=cparams,
        )(xf, r_flat)
    else:
        # Separable path: Rh/Rw only scale O(Ho*H) / O(Wo*W).
        # TODO(synk): add Ho/Wo spatial tiling for planes too large to fit one
        # (Bc,H,W)+(Bc,Ho,Wo) block pair in VMEM.
        rw_t = jnp.asarray(rw_np.T, dtype=cdtype)      # (W, Wo), pre-transposed
        rh = jnp.asarray(rh_np, dtype=cdtype)          # (Ho, H)
        xf = xc.reshape(G, bc, H, W)
        out = pl.pallas_call(
            _upsample_sep_kernel,
            out_shape=jax.ShapeDtypeStruct((G, bc, Ho, Wo), cdtype),
            grid_spec=pltpu.PrefetchScalarGridSpec(
                num_scalar_prefetch=0,
                grid=(G,),
                in_specs=[
                    pl.BlockSpec((None, bc, H, W), lambda i: (i, 0, 0, 0)),
                    pl.BlockSpec((W, Wo), lambda i: (0, 0)),
                    pl.BlockSpec((Ho, H), lambda i: (0, 0)),
                ],
                out_specs=pl.BlockSpec((None, bc, Ho, Wo), lambda i: (i, 0, 0, 0)),
            ),
            compiler_params=cparams,
        )(xf, rw_t, rh)

    out = out.reshape(N, C, Ho, Wo)
    if out.dtype != orig_dtype:
        out = out.astype(orig_dtype)
    return out


if __name__ == "__main__":
    # Test 1: small planes -> fused lane-dense kernel (Bc=4, grid=2).
    key = jax.random.PRNGKey(0)
    N, C, H, W = 2, 4, 16, 16
    s = 2
    x = jax.random.normal(key, (N, C, H, W), dtype=jnp.float32)
    y = jax.block_until_ready(upsample_nearest(x, s))
    ref = jnp.repeat(jnp.repeat(x, s, axis=2), s, axis=3)
    assert y.shape == (N, C, H * s, W * s), y.shape
    assert y.dtype == x.dtype
    assert bool(jnp.all(y == ref)), "mismatch vs nearest-neighbor reference (flat path)"

    # Test 2: bigger planes -> separable kernel (batched planes + slab matmul + batched H matmul).
    x2 = jax.random.normal(jax.random.PRNGKey(1), (2, 4, 40, 24), dtype=jnp.float32)
    y2 = jax.block_until_ready(upsample_nearest(x2, 2))
    ref2 = jnp.repeat(jnp.repeat(x2, 2, axis=2), 2, axis=3)
    assert y2.shape == (2, 4, 80, 48), y2.shape
    assert bool(jnp.all(y2 == ref2)), "mismatch vs nearest-neighbor reference (separable path)"

    print("KERNEL_OK")
</pallas_src>

<mosaic_0001>
module attributes {stable_mosaic.version = 11 : i64} {
  func.func @_upsample_flat_kernel(%arg0: i32, %arg1: memref<1x4x256xf32, #tpu.memory_space<vmem>>, %arg2: memref<256x1024xf32, #tpu.memory_space<vmem>>, %arg3: memref<1x4x1024xf32, #tpu.memory_space<vmem>>) attributes {dimension_semantics = [#tpu.dimension_semantics<parallel>], iteration_bounds = array<i64: 2>, scalar_prefetch = 0 : i64, scratch_operands = 0 : i64, tpu.core_type = #tpu.core_type<tc>, window_params = [{transform_indices = @transform_0, window_bounds = array<i64: 1, 4, 256>}, {pipeline_mode = #tpu.pipeline_mode<synchronous>, transform_indices = @transform_1, window_bounds = array<i64: 256, 1024>}, {transform_indices = @transform_2, window_bounds = array<i64: 1, 4, 1024>}]} {
    %c0 = arith.constant 0 : index
    %c0_0 = arith.constant 0 : index
    %c0_1 = arith.constant 0 : index
    %0 = vector.load %arg1[%c0, %c0_0, %c0_1] : memref<1x4x256xf32, #tpu.memory_space<vmem>>, vector<1x4x256xf32>
    %1 = vector.shape_cast %0 : vector<1x4x256xf32> to vector<4x256xf32>
    %c0_2 = arith.constant 0 : index
    %c0_3 = arith.constant 0 : index
    %2 = vector.load %arg2[%c0_2, %c0_3] : memref<256x1024xf32, #tpu.memory_space<vmem>>, vector<256x1024xf32>
    %cst = arith.constant dense<0.000000e+00> : vector<4x1024xf32>
    %3 = tpu.matmul %1, %2, %cst {dimension_numbers = #tpu.dot_dimension_numbers<[1], [0], [0], [1], [0, 0, 1, 1], [], []>} : vector<4x256xf32>, vector<256x1024xf32>, vector<4x1024xf32> -> vector<4x1024xf32>
    %c0_4 = arith.constant 0 : index
    %c0_5 = arith.constant 0 : index
    %c0_6 = arith.constant 0 : index
    %4 = vector.load %arg3[%c0_4, %c0_5, %c0_6] : memref<1x4x1024xf32, #tpu.memory_space<vmem>>, vector<1x4x1024xf32>
    %5 = vector.shape_cast %4 : vector<1x4x1024xf32> to vector<4x1024xf32>
    %6 = vector.shape_cast %3 : vector<4x1024xf32> to vector<1x4x1024xf32>
    tpu.vector_store %arg3[%c0_4, %c0_5, %c0_6], %6 {strides = array<i32>} : memref<1x4x1024xf32, #tpu.memory_space<vmem>>, vector<1x4x1024xf32>,
    return
  }
  func.func @transform_0(%arg0: i32) -> (i32, i32, i32) {
    %c0_i32 = arith.constant 0 : i32
    %c0_i32_0 = arith.constant 0 : i32
    %c0_i32_1 = arith.constant 0 : i32
    return %arg0, %c0_i32, %c0_i32_0 : i32, i32, i32
  }
  func.func @transform_1(%arg0: i32) -> (i32, i32) {
    %c0_i32 = arith.constant 0 : i32
    %c0_i32_0 = arith.constant 0 : i32
    %c0_i32_1 = arith.constant 0 : i32
    return %c0_i32, %c0_i32_0 : i32, i32
  }
  func.func @transform_2(%arg0: i32) -> (i32, i32, i32) {
    %c0_i32 = arith.constant 0 : i32
    %c0_i32_0 = arith.constant 0 : i32
    %c0_i32_1 = arith.constant 0 : i32
    return %arg0, %c0_i32, %c0_i32_0 : i32, i32, i32
  }
}

</mosaic_0001>

<bundles_post_ra>
// kernel: tpu_custom_call.1
= control target key start
LH: loop header
LB: loop body
LE: loop exit
PB: predicated region body
PF: predicated region fallthrough
CT: control target
= control target key end

     0   :  { %7 = vsyncpa [#allocation3], 0  ;;  %s1532_s0 = inlined_call_operand.hbm [shape: f32[2,4,256], index: 0, kind: input, shape index: {}]   ;;  %s1533_s1 = inlined_call_operand.hbm [shape: f32[256,1024], index: 1, kind: input, shape index: {}]   ;;  %s1534_s2 = inlined_call_operand.hbm [shape: f32[2,4,1024], index: 2, kind: output, shape index: {}]  }
   0x1   :  { %9 = vsyncpa [#allocation3 + $0x1], 0 }
   0x2   :  { %10 = vsyncpa [#allocation6], 0 }
   0x3   :  { %11 = vsyncpa [#allocation4], 0 }
   0x4   :  { %13 = vsyncpa [#allocation4 + $0x1], 0  ;;  %s1318_s9 = smov 0   ;;  %s1320_s10 = smov 0  }
   0x5   :  { %s1322_s11 = smov 0   ;;  %s1324_s12 = smov 0  }
   0x6 LB: > { %s1339_s13 = sadd.s32 4294967295, %s1296_s12   ;;  %s834_s14 = sadd.s32 4294967294, %s1296_s12   ;;  %s1296_s12 = sphi %s1324_s12, %s1554_s12   ;;  %s1292_s11 = sphi %s1322_s11, %s1553_s11   ;;  %s1288_s10 = sphi %s1320_s10, %s1552_s10   ;;  %s1284_s9 = sphi %s1318_s9, %s1551_s9  }
   0x7   : > { %p39_p0 = scmp.ne.s32.totalorder %s1288_s10, %s1284_s9  ;;  %p1535_p1 = scmp.eq.s32.totalorder %s1339_s13, 0 }
   0x8   : > { %p90_p3 = scmp.eq.s32.totalorder %s834_s14, 1  ;;  %p835_p5 = scmp.ge.s32.totalorder %s1296_s12, 1 }
   0x9   : > { %p1348_p4 = por %p1535_p1, %p39_p0  ;;  %p97_p7 = scmp.lt.s32.totalorder %s1296_s12, 3 }
   0xa   : > { %p1353_p6 = por %p90_p3, %p39_p0  ;;  %s1298_s18 = smov [#allocation5]  }
   0xb   : > { %s1538_s15 = scalar_select %p1348_p4, 1, 0 }
   0xc   : > { %s1539_s16 = scalar_select %p1353_p6, 1, 0 }
   0xd   : > { %p1358_p8 = pnand %p835_p5, %p97_p7  ;;  %s109_s19 = sshll.u32 %s1298_s18, 4  ;;  %s1362_s19 = int_to_ptr.vmem [resolvable:$true] %s109_s19 }
   0xe   : > { %s1374_s21 = sadd.s32 1, %s1296_s12   ;;  %s26_s22 = sadd.s32 1, %s1292_s11 }
   0xf   : > { %s1540_s17 = scalar_select %p1358_p8, 1, 0 }
  0x10   : > { %p1116_p9 = pneg %p1358_p8  ;;  %s23_s23 = ssub.s32 %s1296_s12, %s1374_s21 }
  0x11   : > { %s1168_s26 = scalar_lea.hbm %s1533_s1, 32768 }
  0x12   : > { %p1369_p11 = pnand %p1116_p9, %p1535_p1  ;;  %p1169_p12 = scmp.ne.s32.totalorder %s1533_s1, %s1168_s26 }
  0x13   : > { %p1175_p5 = scmp.lt.u32.totalorder %s1168_s26, %s1533_s1 }
  0x14   : > { %p1170_p13 = pneg %p1369_p11 }
  0x16   : > { %p1171_p0 = pnand %p1170_p13, %p1169_p12 }
  0x18   : > { %p1172_p3 = pneg %p1171_p0 }
  0x1a   : > { %p1177_p7 = pnand %p1175_p5, %p1172_p3 }
  0x1c   : > { %1180 = shalt.err (!%p1177_p7)
}
  0x1d   : > { %s1181_s3 = scalar_lea.vmem %s1362_s19, 32768  ;;  %p1189_p2 = scmp.lt.s32.totalorder %s1362_s19, %s1362_s19 }
  0x1e   : > { %p1182_p9 = scmp.ne.s32.totalorder %s1362_s19, %s1181_s3  ;;  %p1190_p6 = scmp.lt.s32.totalorder %s1181_s3, %s1181_s3 }
  0x20   : > { %p1184_p10 = pnand %p1182_p9, %p1170_p13  ;;  %p1191_p4 = por %p1190_p6, %p1189_p2 }
  0x22   : > { %p1185_p1 = pneg %p1184_p10 }
  0x24   : > { %p1192_p8 = pnand %p1191_p4, %p1185_p1 }
  0x26   : > { %1195 = shalt.err (!%p1192_p8)
}
  0x27   : > { %s1299_s4 = smov 1024   ;;  %s1300_s5 = smov 64  }
  0x28   : > { %1119 = dma.hbm_to_vmem [thread:$0]  (!%p1369_p11), %s1533_s1, 32768, %s1362_s19, [#allocation6], %s1299_s4, %s1299_s4, %s1300_s5  }
  0x29   : > { %p24_p2 = scmp.eq.s32.totalorder %s23_s23, 0  ;;  %p33_p1 = scmp.ne.s32.totalorder %s1292_s11, %s1288_s10 }
  0x2a   : > { %p34_p4 = scmp.eq.s32.totalorder %s1296_s12, 0  ;;  %p1129_p6 = scmp.lt.s32.totalorder %s1296_s12, 2 }
  0x2b   : > { %s1405_s8 = scalar_select %p24_p2, %s1292_s11, %s26_s22  }
  0x2c   : > { %p35_p8 = por %p34_p4, %p33_p1  ;;  %p1542_p10 = scmp.eq.s32.totalorder %s1339_s13, 1 }
  0x2d   : > { %s123_s18 = sand.u32 1, %s1292_s11   ;;  %s850_s24 = sshll.u32 %s1296_s12, 7 }
  0x2e   : > { %p1409_p12 = por %p1542_p10, %p33_p1  ;;  %s838_s25 = sshll.u32 %s123_s18, 3 }
  0x2f   : > { %s1418_s27 = scalar_lea.hbm %s1532_s0, %s850_s24  ;;  %s127_s19 = scalar_lea.vmem [#allocation2], %s838_s25 }
  0x30   : > { %s135_s22 = sshll.u32 %s127_s19, 4  ;;  %p1420_p11 = pnand %p1129_p6, %p35_p8  ;;  %s1424_s22 = int_to_ptr.vmem [resolvable:$true] %s135_s22 }
  0x31   : > { %s124_s28 = scalar_lea.sflag [#allocation3], %s123_s18  ;;  %s1196_s29 = scalar_lea.hbm %s1418_s27, 128 }
  0x32   : > { %p1197_p13 = scmp.ne.s32.totalorder %s1418_s27, %s1196_s29  ;;  %p1198_p0 = pneg %p1420_p11 }
  0x33   : > { %s1201_s4 = scalar_lea.hbm %s1532_s0, 256  ;;  %p1202_p7 = scmp.lt.u32.totalorder %s1418_s27, %s1532_s0 }
  0x34   : > { %p1199_p3 = pnand %p1198_p0, %p1197_p13  ;;  %p1203_p9 = scmp.lt.u32.totalorder %s1201_s4, %s1196_s29 }
  0x35   : > { %p1205_p1 = scmp.lt.u32.totalorder %s1196_s29, %s1418_s27 }
  0x36   : > { %p1200_p5 = pneg %p1199_p3  ;;  %p1204_p2 = por %p1203_p9, %p1202_p7 }
  0x38   : > { %p1206_p4 = por %p1205_p1, %p1204_p2 }
  0x3a   : > { %p1207_p6 = pnand %p1206_p4, %p1200_p5 }
  0x3c   : > { %1210 = shalt.err (!%p1207_p6)
}
  0x3d   : > { %s1211_s7 = scalar_lea.vmem %s1424_s22, 128  ;;  %s1301_s18 = smov [#allocation2]  }
  0x3e   : > { %p1212_p8 = scmp.ne.s32.totalorder %s1424_s22, %s1211_s7  ;;  %s1216_s24 = sshll.u32 %s1301_s18, 4  ;;  %s1217_s24 = int_to_ptr.vmem [resolvable:$false] %s1216_s24 }
  0x3f   : > { %s1218_s25 = scalar_lea.vmem %s1217_s24, 256  ;;  %p1219_p3 = scmp.lt.s32.totalorder %s1424_s22, %s1217_s24 }
  0x40   : > { %p1214_p10 = pnand %p1212_p8, %p1198_p0  ;;  %p1220_p7 = scmp.lt.s32.totalorder %s1218_s25, %s1211_s7 }
  0x42   : > { %p1215_p13 = pneg %p1214_p10  ;;  %p1221_p9 = por %p1220_p7, %p1219_p3 }
  0x44   : > { %p1222_p2 = pnand %p1221_p9, %p1215_p13 }
  0x46   : > { %1225 = shalt.err (!%p1222_p2)
}
  0x47   : > { %1123 = dma.hbm_to_vmem [thread:$0]  (!%p1420_p11), %s1418_s27, 128, %s1424_s22, %s124_s28  }
  0x48   : > { %p1545_p5 = scmp.ne.s32.totalorder %s1540_s17, 0 }
  0x49   : > { %s1454_s20 = sand.u32 (!%p1545_p5), 1, %s1288_s10   ;;  %p1546_p0 = scmp.ne.s32.totalorder (!%p1545_p5), %s1538_s15, 0 }
  0x4a   : > { %144 = sbr.rel (%p1545_p5) target bundleno = 447 (0x1bf), region = 28  ;;  %s842_s26 = sshll.u32 (!%p1545_p5), %s1454_s20, 3 }
  0x4b   : > { %s147_s19 = scalar_lea.sflag (!%p1545_p5), [#allocation3], %s1454_s20  ;;  %s1458_s29 = scalar_lea.vmem (!%p1545_p5), [#allocation2], %s842_s26 }
  0x51   : > { %1271 = dma.done.wait (%p1546_p0), %s147_s19, 128  }
  0x52   : > { %1273 = vsyncadd (%p1546_p0), %s147_s19, 4294967168  ;;  %p1547_p11 = scmp.eq.s32.totalorder %s1339_s13, 0 }
  0x54   : > { %1275 = dma.done.wait (%p1547_p11), [#allocation6], 32768   ;;  %p1548_p1 = pmov %p1547_p11 }
  0x55   : > { %v177_v0 = vld [vmem:[#allocation5 + $0x8] sm:$0xff]  ;;  %v179_v2 = vld [vmem:[#allocation5 + $0x18] sm:$0xff]  ;;  %v176_v5 = vld [vmem:[#allocation5] sm:$0xff]  ;;  %s844_s15 = sshll.u32 %s1454_s20, 5  ;;  %s851_s27 = sshll.u32 %s1339_s13, 9 }
  0x56   : > { %1277 = vsyncadd (%p1548_p1), [#allocation6], 4294934528  ;;  %v185_v1 = vld [vmem:[#allocation5 + $0x48] sm:$0xff]  ;;  %v187_v4 = vld [vmem:[#allocation5 + $0x58] sm:$0xff]  ;;  %s174_s17 = scalar_lea.vmem [#allocation7], %s844_s15  ;;  %s1488_s30 = scalar_lea.hbm %s1534_s2, %s851_s27 }
  0x57   : > { %v852_v3 = vpack.c.bf16 %v185_v1, %v177_v0  ;;  %v184_v6 = vld [vmem:[#allocation5 + $0x40] sm:$0xff]  ;;  %v916_v7 = vpack.c.bf16 %v187_v4, %v179_v2  ;;  %v178_v9 = vld [vmem:[#allocation5 + $0x10] sm:$0xff]  ;;  %v193_v11 = vld [vmem:[#allocation5 + $0x88] sm:$0xff]  ;;  %s754_s22 = sshll.u32 %s174_s17, 4  ;;  %s740_s3 = scalar_lea.sflag [#allocation4], %s1454_s20  ;;  %s1490_s22 = int_to_ptr.vmem [resolvable:$true] %s754_s22 }
  0x58   : > { %v854_v8 = vpack.c.bf16 %v184_v6, %v176_v5  ;;  %v186_v10 = vld [vmem:[#allocation5 + $0x50] sm:$0xff]  ;;  %v201_v13 = vld [vmem:[#allocation5 + $0xc8] sm:$0xff]  ;;  %v195_v14 = vld [vmem:[#allocation5 + $0x98] sm:$0xff]  ;;  %s1226_s13 = scalar_lea.vmem %s1490_s22, 512  ;;  %s1302_s4 = smov [#allocation7]  }
  0x59   : > { %853 = vmatprep.subr.bf16.mxu0 %v852_v3  ;;  %v918_v12 = vpack.c.bf16 %v186_v10, %v178_v9  ;;  %v203_v15 = vld [vmem:[#allocation5 + $0xd8] sm:$0xff]  ;;  %917 = vmatprep.subr.bf16.mxu1 %v916_v7  ;;  %v856_v16 = vpack.c.bf16 %v201_v13, %v193_v11  ;;  %v192_v18 = vld [vmem:[#allocation5 + $0x80] sm:$0xff]  ;;  %v194_v20 = vld [vmem:[#allocation5 + $0x90] sm:$0xff]  ;;  %p1227_p4 = scmp.ne.s32.totalorder %s1490_s22, %s1226_s13  ;;  %s1230_s5 = sshll.u32 %s1302_s4, 4  ;;  %s1231_s5 = int_to_ptr.vmem [resolvable:$false] %s1230_s5 }
  0x5a   : > { %855 = vmatpush1.bf16.msra.mxu0 %v854_v8  ;;  %v920_v17 = vpack.c.bf16 %v203_v15, %v195_v14  ;;  %v200_v19 = vld [vmem:[#allocation5 + $0xc0] sm:$0xff]  ;;  %v202_v22 = vld [vmem:[#allocation5 + $0xd0] sm:$0xff]  ;;  %v209_v23 = vld [vmem:[#allocation5 + $0x108] sm:$0xff]  ;;  %s1232_s6 = scalar_lea.vmem %s1231_s5, 1024  ;;  %p1233_p10 = scmp.lt.s32.totalorder %s1490_s22, %s1231_s5 }
  0x5b   : > { %919 = vmatpush1.bf16.msra.mxu1 %v918_v12  ;;  %v858_v21 = vpack.c.bf16 %v200_v19, %v192_v18  ;;  %v217_v24 = vld [vmem:[#allocation5 + $0x148] sm:$0xff]  ;;  %857 = vmatprep.subr.bf16.mxu0 %v856_v16  ;;  %v922_v25 = vpack.c.bf16 %v202_v22, %v194_v20  ;;  %v211_v27 = vld [vmem:[#allocation5 + $0x118] sm:$0xff]  ;;  %v208_v29 = vld [vmem:[#allocation5 + $0x100] sm:$0xff]  ;;  %p1228_p6 = pnand %p1227_p4, %p1409_p12  ;;  %p1234_p13 = scmp.lt.s32.totalorder %s1232_s6, %s1226_s13 }
  0x5c   : > { %921 = vmatprep.subr.bf16.mxu1 %v920_v17  ;;  %v860_v26 = vpack.c.bf16 %v217_v24, %v209_v23  ;;  %v219_v28 = vld [vmem:[#allocation5 + $0x158] sm:$0xff]  ;;  %v216_v31 = vld [vmem:[#allocation5 + $0x140] sm:$0xff]  ;;  %v210_v32 = vld [vmem:[#allocation5 + $0x110] sm:$0xff] }
  0x5d   : > { %v924_v30 = vpack.c.bf16 %v219_v28, %v211_v27  ;;  %v218_v33 = vld [vmem:[#allocation5 + $0x150] sm:$0xff]  ;;  %v862_v34 = vpack.c.bf16 %v216_v31, %v208_v29  ;;  %v225_v35 = vld [vmem:[#allocation5 + $0x188] sm:$0xff]  ;;  %v227_v37 = vld [vmem:[#allocation5 + $0x198] sm:$0xff]  ;;  %p1229_p8 = pneg %p1228_p6  ;;  %p1235_p3 = por %p1234_p13, %p1233_p10 }
  0x5e   : > { %859 = vmatpush1.bf16.msra.mxu0 %v858_v21  ;;  %v233_v36 = vld [vmem:[#allocation5 + $0x1c8] sm:$0xff]  ;;  %v926_v38 = vpack.c.bf16 %v218_v33, %v210_v32  ;;  %v235_v40 = vld [vmem:[#allocation5 + $0x1d8] sm:$0xff]  ;;  %v224_v41 = vld [vmem:[#allocation5 + $0x180] sm:$0xff] }
  0x5f   : > { %923 = vmatpush1.bf16.msra.mxu1 %v922_v25  ;;  %861 = vmatprep.subr.bf16.mxu0 %v860_v26  ;;  %v864_v39 = vpack.c.bf16 %v233_v36, %v225_v35  ;;  %v232_v42 = vld [vmem:[#allocation5 + $0x1c0] sm:$0xff]  ;;  %v928_v43 = vpack.c.bf16 %v235_v40, %v227_v37  ;;  %v226_v44 = vld [vmem:[#allocation5 + $0x190] sm:$0xff]  ;;  %v241_v46 = vld [vmem:[#allocation5 + $0x208] sm:$0xff]  ;;  %p1236_p7 = pnand %p1235_p3, %p1229_p8 }
  0x60   : > { %925 = vmatprep.subr.bf16.mxu1 %v924_v30  ;;  %v234_v45 = vld [vmem:[#allocation5 + $0x1d0] sm:$0xff]  ;;  %v249_v47 = vld [vmem:[#allocation5 + $0x248] sm:$0xff]  ;;  %v243_v48 = vld [vmem:[#allocation5 + $0x218] sm:$0xff]  ;;  %v866_v50 = vpack.c.bf16 %v232_v42, %v224_v41 }
  0x61   : > { %v251_v49 = vld [vmem:[#allocation5 + $0x258] sm:$0xff]  ;;  %v930_v51 = vpack.c.bf16 %v234_v45, %v226_v44  ;;  %v868_v52 = vpack.c.bf16 %v249_v47, %v241_v46  ;;  %v240_v53 = vld [vmem:[#allocation5 + $0x200] sm:$0xff]  ;;  %v242_v55 = vld [vmem:[#allocation5 + $0x210] sm:$0xff] }
  0x62   : > { %863 = vmatpush1.bf16.msra.mxu0 %v862_v34  ;;  %v248_v54 = vld [vmem:[#allocation5 + $0x240] sm:$0xff]  ;;  %v932_v56 = vpack.c.bf16 %v251_v49, %v243_v48  ;;  %v250_v57 = vld [vmem:[#allocation5 + $0x250] sm:$0xff]  ;;  %v257_v58 = vld [vmem:[#allocation5 + $0x288] sm:$0xff] }
  0x63   : > { %927 = vmatpush1.bf16.msra.mxu1 %v926_v38  ;;  %865 = vmatprep.subr.bf16.mxu0 %v864_v39  ;;  %v265_v59 = vld [vmem:[#allocation5 + $0x2c8] sm:$0xff]  ;;  %v259_v60 = vld [vmem:[#allocation5 + $0x298] sm:$0xff]  ;;  %v870_v62 = vpack.c.bf16 %v248_v54, %v240_v53  ;;  %v934_v63 = vpack.c.bf16 %v250_v57, %v242_v55  ;;  %v256_v1 = vld [vmem:[#allocation5 + $0x280] sm:$0xff] }
  0x64   : > { %929 = vmatprep.subr.bf16.mxu1 %v928_v43  ;;  %v267_v61 = vld [vmem:[#allocation5 + $0x2d8] sm:$0xff]  ;;  %v872_v0 = vpack.c.bf16 %v265_v59, %v257_v58  ;;  %v264_v2 = vld [vmem:[#allocation5 + $0x2c0] sm:$0xff]  ;;  %v258_v3 = vld [vmem:[#allocation5 + $0x290] sm:$0xff] }
  0x65   : > { %v936_v4 = vpack.c.bf16 %v267_v61, %v259_v60  ;;  %v266_v5 = vld [vmem:[#allocation5 + $0x2d0] sm:$0xff]  ;;  %v273_v6 = vld [vmem:[#allocation5 + $0x308] sm:$0xff]  ;;  %v275_v8 = vld [vmem:[#allocation5 + $0x318] sm:$0xff]  ;;  %v874_v10 = vpack.c.bf16 %v264_v2, %v256_v1 }
  0x66   : > { %867 = vmatpush1.bf16.msra.mxu0 %v866_v50  ;;  %v281_v7 = vld [vmem:[#allocation5 + $0x348] sm:$0xff]  ;;  %v283_v9 = vld [vmem:[#allocation5 + $0x358] sm:$0xff]  ;;  %v938_v11 = vpack.c.bf16 %v266_v5, %v258_v3  ;;  %v272_v13 = vld [vmem:[#allocation5 + $0x300] sm:$0xff] }
  0x67   : > { %931 = vmatpush1.bf16.msra.mxu1 %v930_v51  ;;  %869 = vmatprep.subr.bf16.mxu0 %v868_v52  ;;  %v876_v12 = vpack.c.bf16 %v281_v7, %v273_v6  ;;  %v280_v14 = vld [vmem:[#allocation5 + $0x340] sm:$0xff]  ;;  %v274_v15 = vld [vmem:[#allocation5 + $0x310] sm:$0xff]  ;;  %v940_v16 = vpack.c.bf16 %v283_v9, %v275_v8  ;;  %v289_v18 = vld [vmem:[#allocation5 + $0x388] sm:$0xff] }
  0x68   : > { %933 = vmatprep.subr.bf16.mxu1 %v932_v56  ;;  %v282_v17 = vld [vmem:[#allocation5 + $0x350] sm:$0xff]  ;;  %v297_v19 = vld [vmem:[#allocation5 + $0x3c8] sm:$0xff]  ;;  %v291_v20 = vld [vmem:[#allocation5 + $0x398] sm:$0xff]  ;;  %v878_v22 = vpack.c.bf16 %v280_v14, %v272_v13 }
  0x69   : > { %v299_v21 = vld [vmem:[#allocation5 + $0x3d8] sm:$0xff]  ;;  %v942_v23 = vpack.c.bf16 %v282_v17, %v274_v15  ;;  %v880_v24 = vpack.c.bf16 %v297_v19, %v289_v18  ;;  %v288_v25 = vld [vmem:[#allocation5 + $0x380] sm:$0xff]  ;;  %v290_v27 = vld [vmem:[#allocation5 + $0x390] sm:$0xff] }
  0x6a   : > { %871 = vmatpush1.bf16.msra.mxu0 %v870_v62  ;;  %v296_v26 = vld [vmem:[#allocation5 + $0x3c0] sm:$0xff]  ;;  %v944_v28 = vpack.c.bf16 %v299_v21, %v291_v20  ;;  %v298_v29 = vld [vmem:[#allocation5 + $0x3d0] sm:$0xff]  ;;  %v305_v30 = vld [vmem:[#allocation5 + $0x408] sm:$0xff] }
  0x6b   : > { %935 = vmatpush1.bf16.msra.mxu1 %v934_v63  ;;  %873 = vmatprep.subr.bf16.mxu0 %v872_v0  ;;  %v313_v31 = vld [vmem:[#allocation5 + $0x448] sm:$0xff]  ;;  %v307_v32 = vld [vmem:[#allocation5 + $0x418] sm:$0xff]  ;;  %v882_v34 = vpack.c.bf16 %v296_v26, %v288_v25  ;;  %v946_v35 = vpack.c.bf16 %v298_v29, %v290_v27  ;;  %v304_v37 = vld [vmem:[#allocation5 + $0x400] sm:$0xff] }
  0x6c   : > { %937 = vmatprep.subr.bf16.mxu1 %v936_v4  ;;  %v315_v33 = vld [vmem:[#allocation5 + $0x458] sm:$0xff]  ;;  %v884_v36 = vpack.c.bf16 %v313_v31, %v305_v30  ;;  %v312_v38 = vld [vmem:[#allocation5 + $0x440] sm:$0xff]  ;;  %v306_v39 = vld [vmem:[#allocation5 + $0x410] sm:$0xff] }
  0x6d   : > { %v948_v40 = vpack.c.bf16 %v315_v33, %v307_v32  ;;  %v314_v41 = vld [vmem:[#allocation5 + $0x450] sm:$0xff]  ;;  %v321_v42 = vld [vmem:[#allocation5 + $0x488] sm:$0xff]  ;;  %v323_v44 = vld [vmem:[#allocation5 + $0x498] sm:$0xff]  ;;  %v886_v46 = vpack.c.bf16 %v312_v38, %v304_v37 }
  0x6e   : > { %875 = vmatpush1.bf16.msra.mxu0 %v874_v10  ;;  %v329_v43 = vld [vmem:[#allocation5 + $0x4c8] sm:$0xff]  ;;  %v331_v45 = vld [vmem:[#allocation5 + $0x4d8] sm:$0xff]  ;;  %v950_v47 = vpack.c.bf16 %v314_v41, %v306_v39  ;;  %v320_v49 = vld [vmem:[#allocation5 + $0x480] sm:$0xff] }
  0x6f   : > { %939 = vmatpush1.bf16.msra.mxu1 %v938_v11  ;;  %877 = vmatprep.subr.bf16.mxu0 %v876_v12  ;;  %v888_v48 = vpack.c.bf16 %v329_v43, %v321_v42  ;;  %v328_v50 = vld [vmem:[#allocation5 + $0x4c0] sm:$0xff]  ;;  %v322_v51 = vld [vmem:[#allocation5 + $0x490] sm:$0xff]  ;;  %v952_v52 = vpack.c.bf16 %v331_v45, %v323_v44  ;;  %v337_v54 = vld [vmem:[#allocation5 + $0x508] sm:$0xff] }
  0x70   : > { %941 = vmatprep.subr.bf16.mxu1 %v940_v16  ;;  %v330_v53 = vld [vmem:[#allocation5 + $0x4d0] sm:$0xff]  ;;  %v345_v55 = vld [vmem:[#allocation5 + $0x548] sm:$0xff]  ;;  %v339_v56 = vld [vmem:[#allocation5 + $0x518] sm:$0xff]  ;;  %v890_v58 = vpack.c.bf16 %v328_v50, %v320_v49 }
  0x71   : > { %v347_v57 = vld [vmem:[#allocation5 + $0x558] sm:$0xff]  ;;  %v954_v59 = vpack.c.bf16 %v330_v53, %v322_v51  ;;  %v892_v60 = vpack.c.bf16 %v345_v55, %v337_v54  ;;  %v336_v61 = vld [vmem:[#allocation5 + $0x500] sm:$0xff]  ;;  %v338_v63 = vld [vmem:[#allocation5 + $0x510] sm:$0xff] }
  0x72   : > { %879 = vmatpush1.bf16.msra.mxu0 %v878_v22  ;;  %v344_v62 = vld [vmem:[#allocation5 + $0x540] sm:$0xff]  ;;  %v956_v0 = vpack.c.bf16 %v347_v57, %v339_v56  ;;  %v346_v1 = vld [vmem:[#allocation5 + $0x550] sm:$0xff]  ;;  %v353_v2 = vld [vmem:[#allocation5 + $0x588] sm:$0xff] }
  0x73   : > { %943 = vmatpush1.bf16.msra.mxu1 %v942_v23  ;;  %881 = vmatprep.subr.bf16.mxu0 %v880_v24  ;;  %v361_v3 = vld [vmem:[#allocation5 + $0x5c8] sm:$0xff]  ;;  %v355_v4 = vld [vmem:[#allocation5 + $0x598] sm:$0xff]  ;;  %v894_v6 = vpack.c.bf16 %v344_v62, %v336_v61  ;;  %v352_v7 = vld [vmem:[#allocation5 + $0x580] sm:$0xff]  ;;  %v958_v8 = vpack.c.bf16 %v346_v1, %v338_v63 }
  0x74   : > { %945 = vmatprep.subr.bf16.mxu1 %v944_v28  ;;  %v363_v5 = vld [vmem:[#allocation5 + $0x5d8] sm:$0xff]  ;;  %v896_v9 = vpack.c.bf16 %v361_v3, %v353_v2  ;;  %v360_v10 = vld [vmem:[#allocation5 + $0x5c0] sm:$0xff]  ;;  %v354_v11 = vld [vmem:[#allocation5 + $0x590] sm:$0xff] }
  0x75   : > { %v362_v12 = vld [vmem:[#allocation5 + $0x5d0] sm:$0xff]  ;;  %v960_v13 = vpack.c.bf16 %v363_v5, %v355_v4  ;;  %v369_v14 = vld [vmem:[#allocation5 + $0x608] sm:$0xff]  ;;  %v371_v17 = vld [vmem:[#allocation5 + $0x618] sm:$0xff]  ;;  %v898_v20 = vpack.c.bf16 %v360_v10, %v352_v7 }
  0x76   : > { %883 = vmatpush1.bf16.msra.mxu0 %v882_v34  ;;  %v377_v15 = vld [vmem:[#allocation5 + $0x648] sm:$0xff]  ;;  %v1469_v16 = vld [vmem:[%s1458_s29] sm:$0xff]  ;;  %v962_v21 = vpack.c.bf16 %v362_v12, %v354_v11  ;;  %v368_v23 = vld [vmem:[#allocation5 + $0x600] sm:$0xff] }
  0x77   : > { %947 = vmatpush1.bf16.msra.mxu1 %v946_v35  ;;  %885 = vmatprep.subr.bf16.mxu0 %v884_v36  ;;  %v379_v18 = vld [vmem:[#allocation5 + $0x658] sm:$0xff]  ;;  %v1473_v19 = vcombine.high %v1469_v16, %v1469_v16  ;;  %v900_v22 = vpack.c.bf16 %v377_v15, %v369_v14  ;;  %v376_v24 = vld [vmem:[#allocation5 + $0x640] sm:$0xff]  ;;  %v370_v25 = vld [vmem:[#allocation5 + $0x610] sm:$0xff] }
  0x78   : > { %949 = vmatprep.subr.bf16.mxu1 %v948_v40  ;;  %v964_v26 = vpack.c.bf16 %v379_v18, %v371_v17  ;;  %v378_v27 = vld [vmem:[#allocation5 + $0x650] sm:$0xff]  ;;  %v385_v28 = vld [vmem:[#allocation5 + $0x688] sm:$0xff]  ;;  %v387_v30 = vld [vmem:[#allocation5 + $0x698] sm:$0xff]  ;;  %v902_v32 = vpack.c.bf16 %v376_v24, %v368_v23 }
  0x79   : > { %v393_v29 = vld [vmem:[#allocation5 + $0x6c8] sm:$0xff]  ;;  %499 = vmatprep.mubr.f32.mxu0 %v1473_v19  ;;  %v395_v31 = vld [vmem:[#allocation5 + $0x6d8] sm:$0xff]  ;;  %570 = vmatprep.mubr.f32.mxu1 %v1473_v19  ;;  %v966_v33 = vpack.c.bf16 %v378_v27, %v370_v25  ;;  %v384_v35 = vld [vmem:[#allocation5 + $0x680] sm:$0xff] }
  0x7a   : > { %887 = vmatpush1.bf16.msra.mxu0 %v886_v46  ;;  %v904_v34 = vpack.c.bf16 %v393_v29, %v385_v28  ;;  %v392_v36 = vld [vmem:[#allocation5 + $0x6c0] sm:$0xff]  ;;  %v386_v37 = vld [vmem:[#allocation5 + $0x690] sm:$0xff]  ;;  %v968_v38 = vpack.c.bf16 %v395_v31, %v387_v30  ;;  %v401_v40 = vld [vmem:[#allocation5 + $0x708] sm:$0xff] }
  0x7b   : > { %951 = vmatpush1.bf16.msra.mxu1 %v950_v47  ;;  %889 = vmatprep.subr.bf16.mxu0 %v888_v48  ;;  %v394_v39 = vld [vmem:[#allocation5 + $0x6d0] sm:$0xff]  ;;  %v409_v41 = vld [vmem:[#allocation5 + $0x748] sm:$0xff]  ;;  %v403_v42 = vld [vmem:[#allocation5 + $0x718] sm:$0xff]  ;;  %v906_v44 = vpack.c.bf16 %v392_v36, %v384_v35 }
  0x7c   : > { %953 = vmatprep.subr.bf16.mxu1 %v952_v52  ;;  %v411_v43 = vld [vmem:[#allocation5 + $0x758] sm:$0xff]  ;;  %v970_v45 = vpack.c.bf16 %v394_v39, %v386_v37  ;;  %v908_v46 = vpack.c.bf16 %v409_v41, %v401_v40  ;;  %v400_v47 = vld [vmem:[#allocation5 + $0x700] sm:$0xff]  ;;  %v402_v49 = vld [vmem:[#allocation5 + $0x710] sm:$0xff] }
  0x7d   : > { %v408_v48 = vld [vmem:[#allocation5 + $0x740] sm:$0xff]  ;;  %v972_v50 = vpack.c.bf16 %v411_v43, %v403_v42  ;;  %v410_v51 = vld [vmem:[#allocation5 + $0x750] sm:$0xff]  ;;  %v417_v52 = vld [vmem:[#allocation5 + $0x788] sm:$0xff] }
  0x7e   : > { %891 = vmatpush1.bf16.msra.mxu0 %v890_v58  ;;  %v425_v53 = vld [vmem:[#allocation5 + $0x7c8] sm:$0xff]  ;;  %v419_v54 = vld [vmem:[#allocation5 + $0x798] sm:$0xff]  ;;  %v910_v56 = vpack.c.bf16 %v408_v48, %v400_v47  ;;  %v974_v57 = vpack.c.bf16 %v410_v51, %v402_v49  ;;  %v418_v61 = vld [vmem:[#allocation5 + $0x790] sm:$0xff] }
  0x7f   : > { %955 = vmatpush1.bf16.msra.mxu1 %v954_v59  ;;  %893 = vmatprep.subr.bf16.mxu0 %v892_v60  ;;  %v427_v55 = vld [vmem:[#allocation5 + $0x7d8] sm:$0xff]  ;;  %v912_v58 = vpack.c.bf16 %v425_v53, %v417_v52  ;;  %v416_v59 = vld [vmem:[#allocation5 + $0x780] sm:$0xff]  ;;  %v426_v63 = vld [vmem:[#allocation5 + $0x7d0] sm:$0xff] }
  0x80   : > { %957 = vmatprep.subr.bf16.mxu1 %v956_v0  ;;  %v424_v60 = vld [vmem:[#allocation5 + $0x7c0] sm:$0xff]  ;;  %v976_v62 = vpack.c.bf16 %v427_v55, %v419_v54  ;;  %v181_v0 = vld [vmem:[#allocation5 + $0x28] sm:$0xff]  ;;  %v183_v2 = vld [vmem:[#allocation5 + $0x38] sm:$0xff]  ;;  %v978_v5 = vpack.c.bf16 %v426_v63, %v418_v61 }
  0x81   : > { %v189_v1 = vld [vmem:[#allocation5 + $0x68] sm:$0xff]  ;;  %v191_v3 = vld [vmem:[#allocation5 + $0x78] sm:$0xff]  ;;  %v914_v4 = vpack.c.bf16 %v424_v60, %v416_v59  ;;  %v180_v7 = vld [vmem:[#allocation5 + $0x20] sm:$0xff] }
  0x82   : > { %895 = vmatpush1.bf16.msra.mxu0 %v894_v6  ;;  %v980_v6 = vpack.c.bf16 %v189_v1, %v181_v0  ;;  %v1044_v10 = vpack.c.bf16 %v191_v3, %v183_v2  ;;  %v190_v11 = vld [vmem:[#allocation5 + $0x70] sm:$0xff]  ;;  %v197_v12 = vld [vmem:[#allocation5 + $0xa8] sm:$0xff]  ;;  %v199_v14 = vld [vmem:[#allocation5 + $0xb8] sm:$0xff] }
  0x83   : > { %959 = vmatpush1.bf16.msra.mxu1 %v958_v8  ;;  %897 = vmatprep.subr.bf16.mxu0 %v896_v9  ;;  %v188_v8 = vld [vmem:[#allocation5 + $0x60] sm:$0xff]  ;;  %v182_v9 = vld [vmem:[#allocation5 + $0x30] sm:$0xff]  ;;  %v207_v15 = vld [vmem:[#allocation5 + $0xf8] sm:$0xff] }
  0x84   : > { %961 = vmatprep.subr.bf16.mxu1 %v960_v13  ;;  %v205_v13 = vld [vmem:[#allocation5 + $0xe8] sm:$0xff]  ;;  %v982_v17 = vpack.c.bf16 %v188_v8, %v180_v7  ;;  %v1046_v18 = vpack.c.bf16 %v190_v11, %v182_v9  ;;  %v198_v23 = vld [vmem:[#allocation5 + $0xb0] sm:$0xff]  ;;  %v1048_v24 = vpack.c.bf16 %v207_v15, %v199_v14  ;;  %v215_v28 = vld [vmem:[#allocation5 + $0x138] sm:$0xff] }
  0x85   : > { %v206_v25 = vld [vmem:[#allocation5 + $0xf0] sm:$0xff]  ;;  %v221_v27 = vld [vmem:[#allocation5 + $0x168] sm:$0xff]  ;;  %v223_v29 = vld [vmem:[#allocation5 + $0x178] sm:$0xff] }
  0x86   : > { %899 = vmatpush1.bf16.msra.mxu0 %v898_v20  ;;  %v984_v20 = vpack.c.bf16 %v205_v13, %v197_v12  ;;  %v1050_v31 = vpack.c.bf16 %v206_v25, %v198_v23  ;;  %v214_v35 = vld [vmem:[#allocation5 + $0x130] sm:$0xff]  ;;  %v1052_v36 = vpack.c.bf16 %v223_v29, %v215_v28  ;;  %v237_v39 = vld [vmem:[#allocation5 + $0x1e8] sm:$0xff]  ;;  %v231_v40 = vld [vmem:[#allocation5 + $0x1b8] sm:$0xff] }
  0x87   : > { %963 = vmatpush1.bf16.msra.mxu1 %v962_v21  ;;  %901 = vmatprep.subr.bf16.mxu0 %v900_v22  ;;  %v196_v21 = vld [vmem:[#allocation5 + $0xa0] sm:$0xff]  ;;  %v222_v37 = vld [vmem:[#allocation5 + $0x170] sm:$0xff]  ;;  %v239_v41 = vld [vmem:[#allocation5 + $0x1f8] sm:$0xff] }
  0x88   : > { %965 = vmatprep.subr.bf16.mxu1 %v964_v26  ;;  %v204_v22 = vld [vmem:[#allocation5 + $0xe0] sm:$0xff]  ;;  %v213_v26 = vld [vmem:[#allocation5 + $0x128] sm:$0xff]  ;;  %v1054_v43 = vpack.c.bf16 %v222_v37, %v214_v35  ;;  %v230_v47 = vld [vmem:[#allocation5 + $0x1b0] sm:$0xff]  ;;  %v1056_v48 = vpack.c.bf16 %v239_v41, %v231_v40 }
  0x89   : > { %v986_v30 = vpack.c.bf16 %v204_v22, %v196_v21  ;;  %v238_v49 = vld [vmem:[#allocation5 + $0x1f0] sm:$0xff]  ;;  %v253_v51 = vld [vmem:[#allocation5 + $0x268] sm:$0xff]  ;;  %v247_v52 = vld [vmem:[#allocation5 + $0x238] sm:$0xff] }
  0x8a   : > { %903 = vmatpush1.bf16.msra.mxu0 %v902_v32  ;;  %v988_v32 = vpack.c.bf16 %v221_v27, %v213_v26  ;;  %v255_v53 = vld [vmem:[#allocation5 + $0x278] sm:$0xff]  ;;  %v254_v60 = vld [vmem:[#allocation5 + $0x270] sm:$0xff]  ;;  %v261_v61 = vld [vmem:[#allocation5 + $0x2a8] sm:$0xff] }
  0x8b   : > { %967 = vmatpush1.bf16.msra.mxu1 %v966_v33  ;;  %905 = vmatprep.subr.bf16.mxu0 %v904_v34  ;;  %v212_v33 = vld [vmem:[#allocation5 + $0x120] sm:$0xff]  ;;  %v1060_v59 = vpack.c.bf16 %v255_v53, %v247_v52  ;;  %v263_v63 = vld [vmem:[#allocation5 + $0x2b8] sm:$0xff]  ;;  %v270_v8 = vld [vmem:[#allocation5 + $0x2f0] sm:$0xff] }
  0x8c   : > { %969 = vmatprep.subr.bf16.mxu1 %v968_v38  ;;  %v220_v34 = vld [vmem:[#allocation5 + $0x160] sm:$0xff]  ;;  %v229_v38 = vld [vmem:[#allocation5 + $0x1a8] sm:$0xff]  ;;  %v271_v0 = vld [vmem:[#allocation5 + $0x2f8] sm:$0xff] }
  0x8d   : > { %v990_v42 = vpack.c.bf16 %v220_v34, %v212_v33  ;;  %v1064_v7 = vpack.c.bf16 %v271_v0, %v263_v63  ;;  %v277_v9 = vld [vmem:[#allocation5 + $0x328] sm:$0xff]  ;;  %v279_v11 = vld [vmem:[#allocation5 + $0x338] sm:$0xff]  ;;  %v286_v22 = vld [vmem:[#allocation5 + $0x370] sm:$0xff] }
  0x8e   : > { %907 = vmatpush1.bf16.msra.mxu0 %v906_v44  ;;  %v992_v44 = vpack.c.bf16 %v237_v39, %v229_v38  ;;  %v287_v12 = vld [vmem:[#allocation5 + $0x378] sm:$0xff]  ;;  %v293_v23 = vld [vmem:[#allocation5 + $0x3a8] sm:$0xff]  ;;  %v302_v34 = vld [vmem:[#allocation5 + $0x3f0] sm:$0xff] }
  0x8f   : > { %971 = vmatpush1.bf16.msra.mxu1 %v970_v45  ;;  %909 = vmatprep.subr.bf16.mxu0 %v908_v46  ;;  %v228_v45 = vld [vmem:[#allocation5 + $0x1a0] sm:$0xff]  ;;  %v1068_v21 = vpack.c.bf16 %v287_v12, %v279_v11  ;;  %v295_v25 = vld [vmem:[#allocation5 + $0x3b8] sm:$0xff]  ;;  %v309_v35 = vld [vmem:[#allocation5 + $0x428] sm:$0xff] }
  0x90   : > { %973 = vmatprep.subr.bf16.mxu1 %v972_v50  ;;  %v236_v46 = vld [vmem:[#allocation5 + $0x1e0] sm:$0xff]  ;;  %v245_v50 = vld [vmem:[#allocation5 + $0x228] sm:$0xff]  ;;  %v303_v26 = vld [vmem:[#allocation5 + $0x3f8] sm:$0xff] }
  0x91   : > { %v994_v54 = vpack.c.bf16 %v236_v46, %v228_v45  ;;  %v996_v55 = vpack.c.bf16 %v253_v51, %v245_v50  ;;  %v1072_v33 = vpack.c.bf16 %v303_v26, %v295_v25  ;;  %v311_v37 = vld [vmem:[#allocation5 + $0x438] sm:$0xff]  ;;  %v318_v46 = vld [vmem:[#allocation5 + $0x470] sm:$0xff] }
  0x92   : > { %911 = vmatpush1.bf16.msra.mxu0 %v910_v56  ;;  %v244_v56 = vld [vmem:[#allocation5 + $0x220] sm:$0xff]  ;;  %v319_v38 = vld [vmem:[#allocation5 + $0x478] sm:$0xff] }
  0x93   : > { %975 = vmatpush1.bf16.msra.mxu1 %v974_v57  ;;  %913 = vmatprep.subr.bf16.mxu0 %v912_v58  ;;  %v252_v57 = vld [vmem:[#allocation5 + $0x260] sm:$0xff]  ;;  %v246_v58 = vld [vmem:[#allocation5 + $0x230] sm:$0xff]  ;;  %v1076_v45 = vpack.c.bf16 %v319_v38, %v311_v37  ;;  %v335_v50 = vld [vmem:[#allocation5 + $0x4f8] sm:$0xff] }
  0x94   : > { %977 = vmatprep.subr.bf16.mxu1 %v976_v62  ;;  %v269_v62 = vld [vmem:[#allocation5 + $0x2e8] sm:$0xff]  ;;  %v998_v1 = vpack.c.bf16 %v252_v57, %v244_v56  ;;  %v1062_v2 = vpack.c.bf16 %v254_v60, %v246_v58  ;;  %v334_v57 = vld [vmem:[#allocation5 + $0x4f0] sm:$0xff]  ;;  %v343_v60 = vld [vmem:[#allocation5 + $0x538] sm:$0xff] }
  0x95   : > { %v1000_v3 = vpack.c.bf16 %v269_v62, %v261_v61  ;;  %v341_v58 = vld [vmem:[#allocation5 + $0x528] sm:$0xff]  ;;  %v351_v61 = vld [vmem:[#allocation5 + $0x578] sm:$0xff] }
  0x96   : > { %915 = vmatpush1.bf16.msra.mxu0 %v914_v4  ;;  %v260_v4 = vld [vmem:[#allocation5 + $0x2a0] sm:$0xff] }
  0x97   : > { %979 = vmatpush1.bf16.msra.mxu1 %v978_v5  ;;  %981 = vmatprep.subr.bf16.mxu0 %v980_v6  ;;  %v268_v5 = vld [vmem:[#allocation5 + $0x2e0] sm:$0xff]  ;;  %v262_v6 = vld [vmem:[#allocation5 + $0x2b0] sm:$0xff] }
  0x98   : > { %1045 = vmatprep.subr.bf16.mxu1 %v1044_v10  ;;  %v285_v10 = vld [vmem:[#allocation5 + $0x368] sm:$0xff]  ;;  %v1002_v13 = vpack.c.bf16 %v268_v5, %v260_v4  ;;  %v1066_v14 = vpack.c.bf16 %v270_v8, %v262_v6  ;;  %v1084_v4 = vpack.c.bf16 %v351_v61, %v343_v60  ;;  %v350_v5 = vld [vmem:[#allocation5 + $0x570] sm:$0xff]  ;;  %v359_v8 = vld [vmem:[#allocation5 + $0x5b8] sm:$0xff] }
  0x99   : > { %500 = vmatmul.mubr.f32.vlgmr.msra.gmra.mrb[0].mxu0 %v1469_v16  ;;  %v1004_v15 = vpack.c.bf16 %v285_v10, %v277_v9  ;;  %v357_v6 = vld [vmem:[#allocation5 + $0x5a8] sm:$0xff]  ;;  %v367_v9 = vld [vmem:[#allocation5 + $0x5f8] sm:$0xff] }
  0x9a   : > { %571 = vmatmul.mubr.f32.vlgmr.msra.gmra.mrb[0].mxu1 %v1469_v16  ;;  %983 = vmatpush1.bf16.msra.mxu0 %v982_v17  ;;  %v276_v17 = vld [vmem:[#allocation5 + $0x320] sm:$0xff] }
  0x9b   : > { %1047 = vmatpush1.bf16.msra.mxu1 %v1046_v18  ;;  %985 = vmatprep.subr.bf16.mxu0 %v984_v20  ;;  %v284_v18 = vld [vmem:[#allocation5 + $0x360] sm:$0xff]  ;;  %v278_v20 = vld [vmem:[#allocation5 + $0x330] sm:$0xff] }
  0x9c   : > { %1049 = vmatprep.subr.bf16.mxu1 %v1048_v24  ;;  %641 = vmatprep.mubr.f32.mxu0 %v1473_v19  ;;  %v301_v24 = vld [vmem:[#allocation5 + $0x3e8] sm:$0xff]  ;;  %v1006_v27 = vpack.c.bf16 %v284_v18, %v276_v17  ;;  %v1070_v28 = vpack.c.bf16 %v286_v22, %v278_v20  ;;  %v1088_v17 = vpack.c.bf16 %v367_v9, %v359_v8  ;;  %v366_v18 = vld [vmem:[#allocation5 + $0x5f0] sm:$0xff]  ;;  %v375_v22 = vld [vmem:[#allocation5 + $0x638] sm:$0xff] }
  0x9d   : > { %712 = vmatprep.mubr.f32.mxu1 %v1473_v19  ;;  %v1058_v19 = vpack.c.bf16 %v238_v49, %v230_v47  ;;  %v1008_v29 = vpack.c.bf16 %v301_v24, %v293_v23  ;;  %v325_v47 = vld [vmem:[#allocation5 + $0x4a8] sm:$0xff]  ;;  %v327_v49 = vld [vmem:[#allocation5 + $0x4b8] sm:$0xff] }
  0x9e   : > { %987 = vmatpush1.bf16.msra.mxu0 %v986_v30  ;;  %v292_v30 = vld [vmem:[#allocation5 + $0x3a0] sm:$0xff]  ;;  %v1080_v56 = vpack.c.bf16 %v335_v50, %v327_v49  ;;  %v373_v20 = vld [vmem:[#allocation5 + $0x628] sm:$0xff]  ;;  %v383_v23 = vld [vmem:[#allocation5 + $0x678] sm:$0xff] }
  0x9f   : > { %1051 = vmatpush1.bf16.msra.mxu1 %v1050_v31  ;;  %989 = vmatprep.subr.bf16.mxu0 %v988_v32  ;;  %v300_v31 = vld [vmem:[#allocation5 + $0x3e0] sm:$0xff]  ;;  %v294_v32 = vld [vmem:[#allocation5 + $0x3b0] sm:$0xff] }
  0xa0   : > { %1053 = vmatprep.subr.bf16.mxu1 %v1052_v36  ;;  %v317_v36 = vld [vmem:[#allocation5 + $0x468] sm:$0xff]  ;;  %v1010_v39 = vpack.c.bf16 %v300_v31, %v292_v30  ;;  %v1074_v40 = vpack.c.bf16 %v302_v34, %v294_v32  ;;  %v1092_v30 = vpack.c.bf16 %v383_v23, %v375_v22  ;;  %v382_v31 = vld [vmem:[#allocation5 + $0x670] sm:$0xff]  ;;  %v391_v34 = vld [vmem:[#allocation5 + $0x6b8] sm:$0xff] }
  0xa1   : > { %v1012_v41 = vpack.c.bf16 %v317_v36, %v309_v35  ;;  %v389_v32 = vld [vmem:[#allocation5 + $0x6a8] sm:$0xff]  ;;  %v399_v35 = vld [vmem:[#allocation5 + $0x6f8] sm:$0xff] }
  0xa2   : > { %991 = vmatpush1.bf16.msra.mxu0 %v990_v42  ;;  %v308_v42 = vld [vmem:[#allocation5 + $0x420] sm:$0xff] }
  0xa3   : > { %1055 = vmatpush1.bf16.msra.mxu1 %v1054_v43  ;;  %993 = vmatprep.subr.bf16.mxu0 %v992_v44  ;;  %v316_v43 = vld [vmem:[#allocation5 + $0x460] sm:$0xff]  ;;  %v310_v44 = vld [vmem:[#allocation5 + $0x430] sm:$0xff] }
  0xa4   : > { %1057 = vmatprep.subr.bf16.mxu1 %v1056_v48  ;;  %v333_v48 = vld [vmem:[#allocation5 + $0x4e8] sm:$0xff]  ;;  %v1014_v51 = vpack.c.bf16 %v316_v43, %v308_v42  ;;  %v1078_v52 = vpack.c.bf16 %v318_v46, %v310_v44  ;;  %v1096_v42 = vpack.c.bf16 %v399_v35, %v391_v34  ;;  %v398_v43 = vld [vmem:[#allocation5 + $0x6f0] sm:$0xff]  ;;  %v407_v46 = vld [vmem:[#allocation5 + $0x738] sm:$0xff] }
  0xa5   : > { %v1016_v53 = vpack.c.bf16 %v333_v48, %v325_v47  ;;  %v405_v44 = vld [vmem:[#allocation5 + $0x728] sm:$0xff]  ;;  %v415_v47 = vld [vmem:[#allocation5 + $0x778] sm:$0xff] }
  0xa6   : > { %995 = vmatpush1.bf16.msra.mxu0 %v994_v54  ;;  %v324_v54 = vld [vmem:[#allocation5 + $0x4a0] sm:$0xff] }
  0xa7   : > { %1059 = vmatpush1.bf16.msra.mxu1 %v1058_v19  ;;  %997 = vmatprep.subr.bf16.mxu0 %v996_v55  ;;  %v332_v19 = vld [vmem:[#allocation5 + $0x4e0] sm:$0xff]  ;;  %v326_v55 = vld [vmem:[#allocation5 + $0x4b0] sm:$0xff] }
  0xa8   : > { %1061 = vmatprep.subr.bf16.mxu1 %v1060_v59  ;;  %v349_v59 = vld [vmem:[#allocation5 + $0x568] sm:$0xff]  ;;  %v1018_v62 = vpack.c.bf16 %v332_v19, %v324_v54  ;;  %v1082_v63 = vpack.c.bf16 %v334_v57, %v326_v55  ;;  %v1100_v54 = vpack.c.bf16 %v415_v47, %v407_v46  ;;  %v414_v19 = vld [vmem:[#allocation5 + $0x770] sm:$0xff]  ;;  %v423_v57 = vld [vmem:[#allocation5 + $0x7b8] sm:$0xff] }
  0xa9   : > { %v1020_v0 = vpack.c.bf16 %v349_v59, %v341_v58  ;;  %v421_v55 = vld [vmem:[#allocation5 + $0x7a8] sm:$0xff]  ;;  %v431_v58 = vld [vmem:[#allocation5 + $0x7f8] sm:$0xff] }
  0xaa   : > { %999 = vmatpush1.bf16.msra.mxu0 %v998_v1  ;;  %v340_v1 = vld [vmem:[#allocation5 + $0x520] sm:$0xff] }
  0xab   : > { %1063 = vmatpush1.bf16.msra.mxu1 %v1062_v2  ;;  %1001 = vmatprep.subr.bf16.mxu0 %v1000_v3  ;;  %v348_v2 = vld [vmem:[#allocation5 + $0x560] sm:$0xff]  ;;  %v342_v3 = vld [vmem:[#allocation5 + $0x530] sm:$0xff] }
  0xac   : > { %1065 = vmatprep.subr.bf16.mxu1 %v1064_v7  ;;  %v365_v7 = vld [vmem:[#allocation5 + $0x5e8] sm:$0xff]  ;;  %v1022_v10 = vpack.c.bf16 %v348_v2, %v340_v1  ;;  %v1086_v11 = vpack.c.bf16 %v350_v5, %v342_v3  ;;  %v422_v1 = vld [vmem:[#allocation5 + $0x7b0] sm:$0xff] }
  0xad   : > { %v1024_v12 = vpack.c.bf16 %v365_v7, %v357_v6  ;;  %v430_v2 = vld [vmem:[#allocation5 + $0x7f0] sm:$0xff] }
  0xae   : > { %1003 = vmatpush1.bf16.msra.mxu0 %v1002_v13  ;;  %v356_v13 = vld [vmem:[#allocation5 + $0x5a0] sm:$0xff] }
  0xaf   : > { %1067 = vmatpush1.bf16.msra.mxu1 %v1066_v14  ;;  %1005 = vmatprep.subr.bf16.mxu0 %v1004_v15  ;;  %v364_v14 = vld [vmem:[#allocation5 + $0x5e0] sm:$0xff]  ;;  %v358_v15 = vld [vmem:[#allocation5 + $0x5b0] sm:$0xff] }
  0xb0   : > { %1069 = vmatprep.subr.bf16.mxu1 %v1068_v21  ;;  %v381_v21 = vld [vmem:[#allocation5 + $0x668] sm:$0xff]  ;;  %v1026_v24 = vpack.c.bf16 %v364_v14, %v356_v13  ;;  %v1090_v25 = vpack.c.bf16 %v366_v18, %v358_v15 }
  0xb1   : > { %v1028_v26 = vpack.c.bf16 %v381_v21, %v373_v20 }
  0xb2   : > { %1007 = vmatpush1.bf16.msra.mxu0 %v1006_v27  ;;  %v372_v27 = vld [vmem:[#allocation5 + $0x620] sm:$0xff] }
  0xb3   : > { %1071 = vmatpush1.bf16.msra.mxu1 %v1070_v28  ;;  %1009 = vmatprep.subr.bf16.mxu0 %v1008_v29  ;;  %v380_v28 = vld [vmem:[#allocation5 + $0x660] sm:$0xff]  ;;  %v374_v29 = vld [vmem:[#allocation5 + $0x630] sm:$0xff] }
  0xb4   : > { %1073 = vmatprep.subr.bf16.mxu1 %v1072_v33  ;;  %v397_v33 = vld [vmem:[#allocation5 + $0x6e8] sm:$0xff]  ;;  %v1030_v36 = vpack.c.bf16 %v380_v28, %v372_v27  ;;  %v1094_v37 = vpack.c.bf16 %v382_v31, %v374_v29 }
  0xb5   : > { %v1032_v38 = vpack.c.bf16 %v397_v33, %v389_v32 }
  0xb6   : > { %1011 = vmatpush1.bf16.msra.mxu0 %v1010_v39  ;;  %v388_v39 = vld [vmem:[#allocation5 + $0x6a0] sm:$0xff] }
  0xb7   : > { %1075 = vmatpush1.bf16.msra.mxu1 %v1074_v40  ;;  %1013 = vmatprep.subr.bf16.mxu0 %v1012_v41  ;;  %v396_v40 = vld [vmem:[#allocation5 + $0x6e0] sm:$0xff]  ;;  %v390_v41 = vld [vmem:[#allocation5 + $0x6b0] sm:$0xff] }
  0xb8   : > { %1077 = vmatprep.subr.bf16.mxu1 %v1076_v45  ;;  %v413_v45 = vld [vmem:[#allocation5 + $0x768] sm:$0xff]  ;;  %v1034_v48 = vpack.c.bf16 %v396_v40, %v388_v39  ;;  %v1098_v49 = vpack.c.bf16 %v398_v43, %v390_v41 }
  0xb9   : > { %v1036_v50 = vpack.c.bf16 %v413_v45, %v405_v44 }
  0xba   : > { %1015 = vmatpush1.bf16.msra.mxu0 %v1014_v51  ;;  %v404_v51 = vld [vmem:[#allocation5 + $0x720] sm:$0xff] }
  0xbb   : > { %1079 = vmatpush1.bf16.msra.mxu1 %v1078_v52  ;;  %1017 = vmatprep.subr.bf16.mxu0 %v1016_v53  ;;  %v412_v52 = vld [vmem:[#allocation5 + $0x760] sm:$0xff]  ;;  %v406_v53 = vld [vmem:[#allocation5 + $0x730] sm:$0xff] }
  0xbc   : > { %1081 = vmatprep.subr.bf16.mxu1 %v1080_v56  ;;  %v429_v56 = vld [vmem:[#allocation5 + $0x7e8] sm:$0xff]  ;;  %v1038_v59 = vpack.c.bf16 %v412_v52, %v404_v51  ;;  %v1102_v60 = vpack.c.bf16 %v414_v19, %v406_v53 }
  0xbd   : > { %v1040_v61 = vpack.c.bf16 %v429_v56, %v421_v55 }
  0xbe   : > { %1019 = vmatpush1.bf16.msra.mxu0 %v1018_v62  ;;  %v420_v62 = vld [vmem:[#allocation5 + $0x7a0] sm:$0xff] }
  0xbf   : > { %1083 = vmatpush1.bf16.msra.mxu1 %v1082_v63  ;;  %1021 = vmatprep.subr.bf16.mxu0 %v1020_v0  ;;  %v428_v63 = vld [vmem:[#allocation5 + $0x7e0] sm:$0xff]  ;;  %v1104_v0 = vpack.c.bf16 %v431_v58, %v423_v57 }
  0xc0   : > { %1085 = vmatprep.subr.bf16.mxu1 %v1084_v4  ;;  %v1042_v3 = vpack.c.bf16 %v428_v63, %v420_v62  ;;  %v1106_v4 = vpack.c.bf16 %v430_v2, %v422_v1 }
  0xc2   : > { %1023 = vmatpush1.bf16.msra.mxu0 %v1022_v10 }
  0xc3   : > { %1087 = vmatpush1.bf16.msra.mxu1 %v1086_v11  ;;  %1025 = vmatprep.subr.bf16.mxu0 %v1024_v12 }
  0xc4   : > { %1089 = vmatprep.subr.bf16.mxu1 %v1088_v17 }
  0xc6   : > { %1027 = vmatpush1.bf16.msra.mxu0 %v1026_v24 }
  0xc7   : > { %1091 = vmatpush1.bf16.msra.mxu1 %v1090_v25  ;;  %1029 = vmatprep.subr.bf16.mxu0 %v1028_v26 }
  0xc8   : > { %1093 = vmatprep.subr.bf16.mxu1 %v1092_v30 }
  0xca   : > { %1031 = vmatpush1.bf16.msra.mxu0 %v1030_v36 }
  0xcb   : > { %1095 = vmatpush1.bf16.msra.mxu1 %v1094_v37  ;;  %1033 = vmatprep.subr.bf16.mxu0 %v1032_v38 }
  0xcc   : > { %1097 = vmatprep.subr.bf16.mxu1 %v1096_v42 }
  0xce   : > { %1035 = vmatpush1.bf16.msra.mxu0 %v1034_v48 }
  0xcf   : > { %1099 = vmatpush1.bf16.msra.mxu1 %v1098_v49  ;;  %1037 = vmatprep.subr.bf16.mxu0 %v1036_v50 }
  0xd0   : > { %1101 = vmatprep.subr.bf16.mxu1 %v1100_v54 }
  0xd2   : > { %1039 = vmatpush1.bf16.msra.mxu0 %v1038_v59 }
  0xd3   : > { %1103 = vmatpush1.bf16.msra.mxu1 %v1102_v60  ;;  %1041 = vmatprep.subr.bf16.mxu0 %v1040_v61 }
  0xd4   : > { %1105 = vmatprep.subr.bf16.mxu1 %v1104_v0 }
  0xd6   : > { %1043 = vmatpush1.bf16.msra.mxu0 %v1042_v3 }
  0xd7   : > { %1107 = vmatpush1.bf16.msra.mxu1 %v1106_v4 }
  0xd9   : > { %642 = vmatmul.mubr.f32.vlgmr.msra.gmra.mrb[2].mxu0 %v1469_v16 }
  0xda   : > { %713 = vmatmul.mubr.f32.vlgmr.msra.gmra.mrb[2].mxu1 %v1469_v16 }
 0x16c   : > { %v501_v5 = vpop.f32.mrb[0].mxu0 }
 0x16d   : > { %v572_v6 = vpop.f32.mrb[0].mxu1  ;;  %v503_v7 = vpop.f32.mrb[1].mxu0 }
 0x16e   : > { %v727_v8 = vcombine.low %v501_v5, %v503_v7  ;;  %v574_v9 = vpop.f32.mrb[1].mxu1 }
 0x16f   : > { %v728_v10 = vcombine.low %v572_v6, %v574_v9 }
 0x170   : > { %735 = vst [vmem:[%s174_s17] sm:$0xff] %v727_v8 }
 0x171   : > { %736 = vst [vmem:[%s174_s17 + $0x8] sm:$0xff] %v728_v10 }
 0x1ac   : > { %v643_v11 = vpop.f32.mrb[2].mxu0 }
 0x1ad   : > { %v714_v12 = vpop.f32.mrb[2].mxu1  ;;  %v645_v13 = vpop.f32.mrb[3].mxu0 }
 0x1ae   : > { %v729_v14 = vcombine.low %v643_v11, %v645_v13  ;;  %v716_v15 = vpop.f32.mrb[3].mxu1 }
 0x1af   : > { %v730_v16 = vcombine.low %v714_v12, %v716_v15 }
 0x1b0   : > { %737 = vst [vmem:[%s174_s17 + $0x10] sm:$0xff] %v729_v14 }
 0x1b1   : > { %738 = vst [vmem:[%s174_s17 + $0x18] sm:$0xff] %v730_v16 }
 0x1b2   : > { %1239 = shalt.err (!%p1236_p7)
}
 0x1b3   : > { %s1240_s7 = scalar_lea.hbm %s1488_s30, 512  ;;  %s1244_s25 = scalar_lea.hbm %s1534_s2, 1024 }
 0x1b4   : > { %p1241_p9 = scmp.ne.s32.totalorder %s1488_s30, %s1240_s7  ;;  %p1245_p0 = scmp.lt.u32.totalorder %s1488_s30, %s1534_s2 }
 0x1b5   : > { %p1246_p11 = scmp.lt.u32.totalorder %s1244_s25, %s1240_s7  ;;  %p1248_p4 = scmp.lt.u32.totalorder %s1240_s7, %s1488_s30 }
 0x1b6   : > { %p1242_p2 = pnand %p1241_p9, %p1409_p12 }
 0x1b7   : > { %p1247_p1 = por %p1246_p11, %p1245_p0 }
 0x1b8   : > { %p1243_p5 = pneg %p1242_p2 }
 0x1b9   : > { %p1249_p6 = por %p1248_p4, %p1247_p1 }
 0x1bb   : > { %p1250_p8 = pnand %p1249_p6, %p1243_p5 }
 0x1bd   : > { %1253 = shalt.err (!%p1250_p8)
}
 0x1be   : > { %1114 = dma.vmem_to_hbm [thread:$0]  (%p1409_p12), %s1490_s22, 512, %s1488_s30, %s740_s3  }
 0x1bf PF: > { %s766_s19 = sand.u32 1, %s1284_s9   ;;  %p1549_p10 = scmp.ne.s32.totalorder %s1539_s16, 0 }
 0x1c0   : > { %p1550_p13 = scmp.ge.s32.totalorder %s1296_s12, 2  ;;  %s767_s29 = scalar_lea.sflag [#allocation4], %s766_s19 }
 0x1c2   : > { %p1125_p3 = pnand %p1550_p13, %p1549_p10 }
 0x1c4   : > { %1279 = dma.done.wait (!%p1125_p3), %s767_s29, 512  }
 0x1c5   : > { %1281 = vsyncadd (!%p1125_p3), %s767_s29, 4294966784  ;;  %p16_p7 = scmp.ge.s32.totalorder %s1374_s21, 4   ;;  %s1551_s9 = smov %s1288_s10 }
 0x1c6   : > { %s1552_s10 = smov %s1292_s11  ;;  %s1553_s11 = smov %s1405_s8 }
 0x1c7   : > { %s1554_s12 = smov %s1374_s21  ;;  %18 = sbr.rel (!%p16_p7) target bundleno = 6 (0x6), region = 77 }
 0x1ce   :  { %772 = vsyncpa [#allocation3], 1 }
 0x1cf   :  { %774 = vsyncpa [#allocation3 + $0x1], 1 }
 0x1d0   :  { %775 = vsyncpa [#allocation6], 1 }
 0x1d1   :  { %776 = vsyncpa [#allocation4], 1 }
 0x1d2   :  { %778 = vsyncpa [#allocation4 + $0x1], 1 }

</bundles_post_ra>
